<compile_context>
chip_gen: v6e
topology: v6e:2x2x1
jax: 0.10.0
libtpu: 0.0.40
codegen_flags: <defaults>
</compile_context>

<pallas_src>
import functools
import math

import jax
import jax.numpy as jnp
from jax.experimental import pallas as pl
from jax.experimental.pallas import tpu as pltpu


DECAY = 0.3      # LIAFLSTMCell default
THRESH = 0.5     # LIFactFun default threshold
SELU_ALPHA = 1.6732632423543772848170429916717
SELU_SCALE = 1.0507009873554804934193349852946


def _selu(x):
    # matches torch.selu / jax.nn.selu constants
    return SELU_SCALE * jnp.where(x > 0, x, SELU_ALPHA * (jnp.exp(x) - 1.0))


def liaf_lstm_kernel(x_ref, w_ref, b_ref, out_ref, xw_s, v_s, c_s,
                     *, tt, bb, hidden):
    """One (batch block, time tile) grid step of `tt` timesteps.

    x_ref:  (tt*bb, N)   bf16 time-major input rows of this batch block
    w_ref:  (N, 4H)      bf16 fused gate weights [Wi|Wf|Wg|Wo]
    b_ref:  (1, 4H)      f32  fused gate biases
    out_ref:(bb, tt*H)   f32  lane-packed outputs (col block s = timestep s)
    xw_s:   (tt*bb, 4H)  f32  fused gate pre-activations (scratch)
    v_s:    (bb, 4H)     f32  membrane state [vi|vf|vg|vo] (carried over time)
    c_s:    (bb, H)      f32  cell state (carried over time)
    """
    H = hidden
    H4 = 4 * H

    # Zero the carried state at the start of every batch block's time sweep.
    @pl.when(pl.program_id(1) == 0)
    def _init():
        v_s[...] = jnp.zeros_like(v_s)
        c_s[...] = jnp.zeros_like(c_s)

    # Single fused MXU matmul: all 4 gates x all `tt` timesteps of this tile.
    # bf16 operands, f32 accumulation; bias added once for the whole tile.
    xw_s[...] = jnp.dot(x_ref[...], w_ref[...],
                        preferred_element_type=jnp.float32) + b_ref[...]

    # Lane mask selecting the g-gate lanes [2H, 3H); hoisted out of the loop.
    lane = jax.lax.broadcasted_iota(jnp.int32, (bb, H4), 1)
    is_g = jnp.logical_and(lane >= 2 * H, lane < 3 * H)

    def step(s, carry):
        v_prev, c_prev = carry
        row = pl.multiple_of(s * bb, bb)                 # sublane-aligned
        # v = (x W + b) + v_prev   (all f32 from here on)
        v = xw_s[pl.ds(row, bb), :] + v_prev             # (bb, 4H)
        # relu on i/f/o lanes, selu on g lanes, computed at full vreg width.
        act = jnp.where(is_g, _selu(v), jnp.maximum(v, 0.0))
        i_g = act[:, 0 * H:1 * H]
        f_g = act[:, 1 * H:2 * H]
        g_g = act[:, 2 * H:3 * H]
        o_g = act[:, 3 * H:4 * H]
        c_new = c_prev * f_g + i_g * g_g
        out_ref[:, pl.ds(s * H, H)] = (_selu(c_new) * o_g).astype(out_ref.dtype)
        # fused spike-reset + leaky decay: decay*(1-fire)*v == where(v>thr,0,decay*v)
        v_new = jnp.where(v > THRESH, 0.0, DECAY * v)
        return (v_new, c_new)

    v_fin, c_fin = jax.lax.fori_loop(0, tt, step, (v_s[...], c_s[...]),
                                     unroll=True)
    v_s[...] = v_fin
    c_s[...] = c_fin


def liaf_lstm_cell(x, params, *, time_tile=32, batch_block=8,
                   matmul_dtype=jnp.bfloat16):
    """x: (B, T, N) float32. Returns (B, T, H) float32."""
    B, T, N = x.shape
    H4 = params["w_all"].shape[1]
    H = H4 // 4

    # Lane-dense output requires tt*H to be a multiple of 128.
    lane_mult = 128 // math.gcd(H, 128)
    tt = max(1, min(time_tile, T))
    tt = -(-tt // lane_mult) * lane_mult          # round up
    T_pad = -(-T // tt) * tt
    ntt = T_pad // tt

    bb = max(8, (batch_block // 8) * 8)           # sublane-aligned batch block
    B_pad = -(-B // bb) * bb
    nbb = B_pad // bb

    # (B, T, N) -> (nbb, T_pad, bb, N) -> time-major rows per batch block.
    # Cast to the matmul dtype FIRST so the re-layout copy is written in bf16
    # (half the HBM traffic of f32).
    xq = x.astype(matmul_dtype)
    xq = jnp.pad(xq, ((0, B_pad - B), (0, T_pad - T), (0, 0)))
    xq = xq.reshape(nbb, bb, T_pad, N).transpose(0, 2, 1, 3)
    x_rows = xq.reshape(nbb * T_pad * bb, N)

    w_all = params["w_all"].astype(matmul_dtype)     # (N, 4H)
    b_all = params["b_all"].astype(jnp.float32)      # (1, 4H)

    rows_per_tile = tt * bb
    grid = (nbb, ntt)

    kernel = functools.partial(liaf_lstm_kernel, tt=tt, bb=bb, hidden=H)

    out_packed = pl.pallas_call(
        kernel,
        out_shape=jax.ShapeDtypeStruct((B_pad, T_pad * H), jnp.float32),
        grid_spec=pltpu.PrefetchScalarGridSpec(
            num_scalar_prefetch=0,
            grid=grid,
            in_specs=[
                # rows of this (batch block, time tile)
                pl.BlockSpec((rows_per_tile, N), lambda j, i: (j * ntt + i, 0)),
                # Constant-index weight/bias blocks: DMA'd once, stay resident.
                pl.BlockSpec((N, H4), lambda j, i: (0, 0)),
                pl.BlockSpec((1, H4), lambda j, i: (0, 0)),
            ],
            # Lane-packed output slab: tt*H lanes (>=128) per grid step.
            out_specs=pl.BlockSpec((bb, tt * H), lambda j, i: (j, i)),
            scratch_shapes=[
                pltpu.VMEM((rows_per_tile, H4), jnp.float32),  # gate pre-acts
                pltpu.VMEM((bb, H4), jnp.float32),             # [vi|vf|vg|vo]
                pltpu.VMEM((bb, H), jnp.float32),              # cell state c
            ],
        ),
        compiler_params=pltpu.CompilerParams(
            # batch blocks independent -> parallel (uses both TCs on v7x);
            # time tiles carry recurrent state -> arbitrary (sequential).
            dimension_semantics=("parallel", "arbitrary"),
            vmem_limit_bytes=32 * 1024 * 1024,
        ),
    )(x_rows, w_all, b_all)

    out = out_packed.reshape(B_pad, T_pad, H)
    return out[:B, :T, :]


def init_params(key, input_size, hidden_size):
    """Mirrors paramInit: kaiming-normal weights (fan_in = input_size), bias=0.5.
    Stored fused & pre-transposed: w_all = [Wi|Wf|Wg|Wo]^T of shape (N, 4H)."""
    ks = jax.random.split(key, 4)
    std = (2.0 / input_size) ** 0.5

    def w(k):
        # torch Linear weight is (H, N); store W^T = (N, H)
        return (jax.random.normal(k, (hidden_size, input_size), jnp.float32) * std).T

    w_all = jnp.concatenate([w(ks[0]), w(ks[1]), w(ks[2]), w(ks[3])], axis=1)
    b_all = jnp.full((1, 4 * hidden_size), 0.5, jnp.float32)
    return {"w_all": w_all, "b_all": b_all}


def liaf_lstm_ref(x, params, matmul_dtype=jnp.bfloat16):
    """Pure-JAX reference of the PyTorch forward loop (same bf16 matmul
    operands as the kernel so spike decisions are made on identical values)."""
    B, T, N = x.shape
    H4 = params["w_all"].shape[1]
    H = H4 // 4
    w = params["w_all"].astype(matmul_dtype)
    b = params["b_all"].astype(jnp.float32)
    v = jnp.zeros((B, H4), jnp.float32)
    c = jnp.zeros((B, H), jnp.float32)
    outs = []
    for t in range(T):
        xt = x[:, t, :].astype(matmul_dtype)
        v = jnp.dot(xt, w, preferred_element_type=jnp.float32) + b + v
        vi, vf, vg, vo = v[:, :H], v[:, H:2 * H], v[:, 2 * H:3 * H], v[:, 3 * H:]
        i_g, f_g, o_g = jnp.maximum(vi, 0.0), jnp.maximum(vf, 0.0), jnp.maximum(vo, 0.0)
        g_g = _selu(vg)
        c = c * f_g + i_g * g_g
        outs.append(_selu(c) * o_g)
        v = jnp.where(v > THRESH, 0.0, DECAY * v)   # == decay*(1-fire)*v
    return jnp.stack(outs, axis=1)


if __name__ == "__main__":
    key = jax.random.PRNGKey(0)
    kx1, kx2, kp = jax.random.split(key, 3)

    N, H = 16, 32
    params = init_params(kp, N, H)

    # Case 1: module-default shape (timeWindows=5), default time_tile.
    B, T = 2, 5
    x1 = jax.random.normal(kx1, (B, T, N), jnp.float32)
    out1 = jax.block_until_ready(jax.jit(liaf_lstm_cell)(x1, params))
    ref1 = liaf_lstm_ref(x1, params)
    assert out1.shape == (B, T, H)
    err1 = float(jnp.max(jnp.abs(out1 - ref1)))
    assert jnp.allclose(out1, ref1, atol=2e-2, rtol=2e-2), err1

    # Case 2: small time_tile -> multiple time tiles (state carried across
    # grid steps) + multiple batch blocks + batch/time padding (exercises the
    # per-batch-block state re-init on the 2-D ("parallel","arbitrary") grid).
    B2, T2 = 18, 7
    x2 = jax.random.normal(kx2, (B2, T2, N), jnp.float32)
    run2 = jax.jit(functools.partial(liaf_lstm_cell, time_tile=4))
    out2 = jax.block_until_ready(run2(x2, params))
    ref2 = liaf_lstm_ref(x2, params)
    assert out2.shape == (B2, T2, H)
    err2 = float(jnp.max(jnp.abs(out2 - ref2)))
    assert jnp.allclose(out2, ref2, atol=2e-2, rtol=2e-2), err2

    print("KERNEL_OK")
</pallas_src>

<mosaic_0001>
module attributes {stable_mosaic.version = 11 : i64} {
  func.func @liaf_lstm_kernel(%arg0: i32, %arg1: i32, %arg2: memref<64x16xbf16, #tpu.memory_space<vmem>>, %arg3: memref<16x128xbf16, #tpu.memory_space<vmem>>, %arg4: memref<1x128xf32, #tpu.memory_space<vmem>>, %arg5: memref<8x256xf32, #tpu.memory_space<vmem>>, %arg6: memref<64x128xf32, #tpu.memory_space<vmem>>, %arg7: memref<8x128xf32, #tpu.memory_space<vmem>>, %arg8: memref<8x32xf32, #tpu.memory_space<vmem>>) attributes {dimension_semantics = [#tpu.dimension_semantics<parallel>, #tpu.dimension_semantics<arbitrary>], iteration_bounds = array<i64: 1, 1>, scalar_prefetch = 0 : i64, scratch_operands = 3 : i64, tpu.core_type = #tpu.core_type<tc>, window_params = [{transform_indices = @transform_0, window_bounds = array<i64: 64, 16>}, {pipeline_mode = #tpu.pipeline_mode<synchronous>, transform_indices = @transform_1, window_bounds = array<i64: 16, 128>}, {pipeline_mode = #tpu.pipeline_mode<synchronous>, transform_indices = @transform_2, window_bounds = array<i64: 1, 128>}, {transform_indices = @transform_3, window_bounds = array<i64: 8, 256>}]} {
    %c0_i32 = arith.constant 0 : i32
    %0 = arith.cmpi eq, %arg1, %c0_i32 : i32
    %1 = arith.extui %0 : i1 to i32
    %c0_i32_0 = arith.constant 0 : i32
    %2 = arith.cmpi ne, %1, %c0_i32_0 : i32
    scf.if %2 {
      %cst_144 = arith.constant 0.000000e+00 : f32
      %380 = vector.broadcast %cst_144 : f32 to vector<8x128xf32>
      %c0_145 = arith.constant 0 : index
      %c0_146 = arith.constant 0 : index
      %381 = vector.load %arg7[%c0_145, %c0_146] : memref<8x128xf32, #tpu.memory_space<vmem>>, vector<8x128xf32>
      tpu.vector_store %arg7[%c0_145, %c0_146], %380 {strides = array<i32>} : memref<8x128xf32, #tpu.memory_space<vmem>>, vector<8x128xf32>,
      %cst_147 = arith.constant 0.000000e+00 : f32
      %382 = vector.broadcast %cst_147 : f32 to vector<8x32xf32>
      %c0_148 = arith.constant 0 : index
      %c0_149 = arith.constant 0 : index
      %383 = vector.load %arg8[%c0_148, %c0_149] : memref<8x32xf32, #tpu.memory_space<vmem>>, vector<8x32xf32>
      tpu.vector_store %arg8[%c0_148, %c0_149], %382 {strides = array<i32>} : memref<8x32xf32, #tpu.memory_space<vmem>>, vector<8x32xf32>,
    } else {
    }
    %c0 = arith.constant 0 : index
    %c0_1 = arith.constant 0 : index
    %3 = vector.load %arg2[%c0, %c0_1] : memref<64x16xbf16, #tpu.memory_space<vmem>>, vector<64x16xbf16>
    %c0_2 = arith.constant 0 : index
    %c0_3 = arith.constant 0 : index
    %4 = vector.load %arg3[%c0_2, %c0_3] : memref<16x128xbf16, #tpu.memory_space<vmem>>, vector<16x128xbf16>
    %cst = arith.constant dense<0.000000e+00> : vector<64x128xf32>
    %5 = tpu.matmul %3, %4, %cst {dimension_numbers = #tpu.dot_dimension_numbers<[1], [0], [0], [1], [0, 0, 1, 1], [], []>} : vector<64x16xbf16>, vector<16x128xbf16>, vector<64x128xf32> -> vector<64x128xf32>
    %c0_4 = arith.constant 0 : index
    %c0_5 = arith.constant 0 : index
    %6 = vector.load %arg4[%c0_4, %c0_5] : memref<1x128xf32, #tpu.memory_space<vmem>>, vector<1x128xf32>
    %7 = vector.broadcast %6 : vector<1x128xf32> to vector<64x128xf32>
    %8 = arith.addf %5, %7 : vector<64x128xf32>
    %c0_6 = arith.constant 0 : index
    %c0_7 = arith.constant 0 : index
    %9 = vector.load %arg6[%c0_6, %c0_7] : memref<64x128xf32, #tpu.memory_space<vmem>>, vector<64x128xf32>
    tpu.vector_store %arg6[%c0_6, %c0_7], %8 {strides = array<i32>} : memref<64x128xf32, #tpu.memory_space<vmem>>, vector<64x128xf32>,
    %10 = tpu.iota {dimensions = array<i32: 1>} : vector<8x128xi32>
    %c64_i32 = arith.constant 64 : i32
    %11 = vector.broadcast %c64_i32 : i32 to vector<8x128xi32>
    %12 = arith.cmpi sge, %10, %11 : vector<8x128xi32>
    %c96_i32 = arith.constant 96 : i32
    %13 = vector.broadcast %c96_i32 : i32 to vector<8x128xi32>
    %14 = arith.cmpi slt, %10, %13 : vector<8x128xi32>
    %15 = arith.andi %12, %14 : vector<8x128xi1>
    %c0_8 = arith.constant 0 : index
    %c0_9 = arith.constant 0 : index
    %16 = vector.load %arg7[%c0_8, %c0_9] : memref<8x128xf32, #tpu.memory_space<vmem>>, vector<8x128xf32>
    %c0_10 = arith.constant 0 : index
    %c0_11 = arith.constant 0 : index
    %17 = vector.load %arg8[%c0_10, %c0_11] : memref<8x32xf32, #tpu.memory_space<vmem>>, vector<8x32xf32>
    %c0_i32_12 = arith.constant 0 : i32
    %c8_i32 = arith.constant 8 : i32
    %18 = arith.muli %c0_i32_12, %c8_i32 : i32
    %19 = tpu.assume_multiple %18, 8 : i32
    %20 = arith.index_cast %19 : i32 to index
    %c0_13 = arith.constant 0 : index
    %21 = vector.load %arg6[%20, %c0_13] : memref<64x128xf32, #tpu.memory_space<vmem>>, vector<8x128xf32>
    %22 = arith.addf %21, %16 : vector<8x128xf32>
    %cst_14 = arith.constant 0.000000e+00 : f32
    %23 = vector.broadcast %cst_14 : f32 to vector<8x128xf32>
    %24 = arith.cmpf ogt, %22, %23 : vector<8x128xf32>
    %25 = math.exp %22 : vector<8x128xf32>
    %cst_15 = arith.constant 1.000000e+00 : f32
    %26 = vector.broadcast %cst_15 : f32 to vector<8x128xf32>
    %27 = arith.subf %25, %26 : vector<8x128xf32>
    %cst_16 = arith.constant 1.67326319 : f32
    %28 = vector.broadcast %cst_16 : f32 to vector<8x128xf32>
    %29 = arith.mulf %28, %27 : vector<8x128xf32>
    %30 = arith.select %24, %22, %29 : vector<8x128xi1>, vector<8x128xf32>
    %cst_17 = arith.constant 1.05070102 : f32
    %31 = vector.broadcast %cst_17 : f32 to vector<8x128xf32>
    %32 = arith.mulf %31, %30 : vector<8x128xf32>
    %cst_18 = arith.constant 0.000000e+00 : f32
    %33 = vector.broadcast %cst_18 : f32 to vector<8x128xf32>
    %34 = arith.maximumf %22, %33 : vector<8x128xf32>
    %35 = arith.select %15, %32, %34 : vector<8x128xi1>, vector<8x128xf32>
    %36 = vector.extract_strided_slice %35 {offsets = [0, 0], sizes = [8, 32], strides = [1, 1]} : vector<8x128xf32> to vector<8x32xf32>
    %37 = vector.extract_strided_slice %35 {offsets = [0, 32], sizes = [8, 32], strides = [1, 1]} : vector<8x128xf32> to vector<8x32xf32>
    %38 = vector.extract_strided_slice %35 {offsets = [0, 64], sizes = [8, 32], strides = [1, 1]} : vector<8x128xf32> to vector<8x32xf32>
    %39 = vector.extract_strided_slice %35 {offsets = [0, 96], sizes = [8, 32], strides = [1, 1]} : vector<8x128xf32> to vector<8x32xf32>
    %40 = arith.mulf %17, %37 : vector<8x32xf32>
    %41 = arith.mulf %36, %38 : vector<8x32xf32>
    %42 = arith.addf %40, %41 : vector<8x32xf32>
    %cst_19 = arith.constant 0.000000e+00 : f32
    %43 = vector.broadcast %cst_19 : f32 to vector<8x32xf32>
    %44 = arith.cmpf ogt, %42, %43 : vector<8x32xf32>
    %45 = math.exp %42 : vector<8x32xf32>
    %cst_20 = arith.constant 1.000000e+00 : f32
    %46 = vector.broadcast %cst_20 : f32 to vector<8x32xf32>
    %47 = arith.subf %45, %46 : vector<8x32xf32>
    %cst_21 = arith.constant 1.67326319 : f32
    %48 = vector.broadcast %cst_21 : f32 to vector<8x32xf32>
    %49 = arith.mulf %48, %47 : vector<8x32xf32>
    %50 = arith.select %44, %42, %49 : vector<8x32xi1>, vector<8x32xf32>
    %cst_22 = arith.constant 1.05070102 : f32
    %51 = vector.broadcast %cst_22 : f32 to vector<8x32xf32>
    %52 = arith.mulf %51, %50 : vector<8x32xf32>
    %53 = arith.mulf %52, %39 : vector<8x32xf32>
    %c32_i32 = arith.constant 32 : i32
    %54 = arith.muli %c0_i32_12, %c32_i32 : i32
    %c0_23 = arith.constant 0 : index
    %55 = arith.index_cast %54 : i32 to index
    %56 = vector.load %arg5[%c0_23, %55] : memref<8x256xf32, #tpu.memory_space<vmem>>, vector<8x32xf32>
    tpu.vector_store %arg5[%c0_23, %55], %53 {strides = array<i32>} : memref<8x256xf32, #tpu.memory_space<vmem>>, vector<8x32xf32>,
    %cst_24 = arith.constant 5.000000e-01 : f32
    %57 = vector.broadcast %cst_24 : f32 to vector<8x128xf32>
    %58 = arith.cmpf ogt, %22, %57 : vector<8x128xf32>
    %cst_25 = arith.constant 3.000000e-01 : f32
    %59 = vector.broadcast %cst_25 : f32 to vector<8x128xf32>
    %60 = arith.mulf %59, %22 : vector<8x128xf32>
    %cst_26 = arith.constant 0.000000e+00 : f32
    %61 = vector.broadcast %cst_26 : f32 to vector<8x128xf32>
    %62 = arith.select %58, %61, %60 : vector<8x128xi1>, vector<8x128xf32>
    %c1_i32 = arith.constant 1 : i32
    %c8_i32_27 = arith.constant 8 : i32
    %63 = arith.muli %c1_i32, %c8_i32_27 : i32
    %64 = tpu.assume_multiple %63, 8 : i32
    %65 = arith.index_cast %64 : i32 to index
    %c0_28 = arith.constant 0 : index
    %66 = vector.load %arg6[%65, %c0_28] : memref<64x128xf32, #tpu.memory_space<vmem>>, vector<8x128xf32>
    %67 = arith.addf %66, %62 : vector<8x128xf32>
    %cst_29 = arith.constant 0.000000e+00 : f32
    %68 = vector.broadcast %cst_29 : f32 to vector<8x128xf32>
    %69 = arith.cmpf ogt, %67, %68 : vector<8x128xf32>
    %70 = math.exp %67 : vector<8x128xf32>
    %cst_30 = arith.constant 1.000000e+00 : f32
    %71 = vector.broadcast %cst_30 : f32 to vector<8x128xf32>
    %72 = arith.subf %70, %71 : vector<8x128xf32>
    %cst_31 = arith.constant 1.67326319 : f32
    %73 = vector.broadcast %cst_31 : f32 to vector<8x128xf32>
    %74 = arith.mulf %73, %72 : vector<8x128xf32>
    %75 = arith.select %69, %67, %74 : vector<8x128xi1>, vector<8x128xf32>
    %cst_32 = arith.constant 1.05070102 : f32
    %76 = vector.broadcast %cst_32 : f32 to vector<8x128xf32>
    %77 = arith.mulf %76, %75 : vector<8x128xf32>
    %cst_33 = arith.constant 0.000000e+00 : f32
    %78 = vector.broadcast %cst_33 : f32 to vector<8x128xf32>
    %79 = arith.maximumf %67, %78 : vector<8x128xf32>
    %80 = arith.select %15, %77, %79 : vector<8x128xi1>, vector<8x128xf32>
    %81 = vector.extract_strided_slice %80 {offsets = [0, 0], sizes = [8, 32], strides = [1, 1]} : vector<8x128xf32> to vector<8x32xf32>
    %82 = vector.extract_strided_slice %80 {offsets = [0, 32], sizes = [8, 32], strides = [1, 1]} : vector<8x128xf32> to vector<8x32xf32>
    %83 = vector.extract_strided_slice %80 {offsets = [0, 64], sizes = [8, 32], strides = [1, 1]} : vector<8x128xf32> to vector<8x32xf32>
    %84 = vector.extract_strided_slice %80 {offsets = [0, 96], sizes = [8, 32], strides = [1, 1]} : vector<8x128xf32> to vector<8x32xf32>
    %85 = arith.mulf %42, %82 : vector<8x32xf32>
    %86 = arith.mulf %81, %83 : vector<8x32xf32>
    %87 = arith.addf %85, %86 : vector<8x32xf32>
    %cst_34 = arith.constant 0.000000e+00 : f32
    %88 = vector.broadcast %cst_34 : f32 to vector<8x32xf32>
    %89 = arith.cmpf ogt, %87, %88 : vector<8x32xf32>
    %90 = math.exp %87 : vector<8x32xf32>
    %cst_35 = arith.constant 1.000000e+00 : f32
    %91 = vector.broadcast %cst_35 : f32 to vector<8x32xf32>
    %92 = arith.subf %90, %91 : vector<8x32xf32>
    %cst_36 = arith.constant 1.67326319 : f32
    %93 = vector.broadcast %cst_36 : f32 to vector<8x32xf32>
    %94 = arith.mulf %93, %92 : vector<8x32xf32>
    %95 = arith.select %89, %87, %94 : vector<8x32xi1>, vector<8x32xf32>
    %cst_37 = arith.constant 1.05070102 : f32
    %96 = vector.broadcast %cst_37 : f32 to vector<8x32xf32>
    %97 = arith.mulf %96, %95 : vector<8x32xf32>
    %98 = arith.mulf %97, %84 : vector<8x32xf32>
    %c32_i32_38 = arith.constant 32 : i32
    %99 = arith.muli %c1_i32, %c32_i32_38 : i32
    %c0_39 = arith.constant 0 : index
    %100 = arith.index_cast %99 : i32 to index
    %101 = vector.load %arg5[%c0_39, %100] : memref<8x256xf32, #tpu.memory_space<vmem>>, vector<8x32xf32>
    tpu.vector_store %arg5[%c0_39, %100], %98 {strides = array<i32>} : memref<8x256xf32, #tpu.memory_space<vmem>>, vector<8x32xf32>,
    %cst_40 = arith.constant 5.000000e-01 : f32
    %102 = vector.broadcast %cst_40 : f32 to vector<8x128xf32>
    %103 = arith.cmpf ogt, %67, %102 : vector<8x128xf32>
    %cst_41 = arith.constant 3.000000e-01 : f32
    %104 = vector.broadcast %cst_41 : f32 to vector<8x128xf32>
    %105 = arith.mulf %104, %67 : vector<8x128xf32>
    %cst_42 = arith.constant 0.000000e+00 : f32
    %106 = vector.broadcast %cst_42 : f32 to vector<8x128xf32>
    %107 = arith.select %103, %106, %105 : vector<8x128xi1>, vector<8x128xf32>
    %c2_i32 = arith.constant 2 : i32
    %c8_i32_43 = arith.constant 8 : i32
    %108 = arith.muli %c2_i32, %c8_i32_43 : i32
    %109 = tpu.assume_multiple %108, 8 : i32
    %110 = arith.index_cast %109 : i32 to index
    %c0_44 = arith.constant 0 : index
    %111 = vector.load %arg6[%110, %c0_44] : memref<64x128xf32, #tpu.memory_space<vmem>>, vector<8x128xf32>
    %112 = arith.addf %111, %107 : vector<8x128xf32>
    %cst_45 = arith.constant 0.000000e+00 : f32
    %113 = vector.broadcast %cst_45 : f32 to vector<8x128xf32>
    %114 = arith.cmpf ogt, %112, %113 : vector<8x128xf32>
    %115 = math.exp %112 : vector<8x128xf32>
    %cst_46 = arith.constant 1.000000e+00 : f32
    %116 = vector.broadcast %cst_46 : f32 to vector<8x128xf32>
    %117 = arith.subf %115, %116 : vector<8x128xf32>
    %cst_47 = arith.constant 1.67326319 : f32
    %118 = vector.broadcast %cst_47 : f32 to vector<8x128xf32>
    %119 = arith.mulf %118, %117 : vector<8x128xf32>
    %120 = arith.select %114, %112, %119 : vector<8x128xi1>, vector<8x128xf32>
    %cst_48 = arith.constant 1.05070102 : f32
    %121 = vector.broadcast %cst_48 : f32 to vector<8x128xf32>
    %122 = arith.mulf %121, %120 : vector<8x128xf32>
    %cst_49 = arith.constant 0.000000e+00 : f32
    %123 = vector.broadcast %cst_49 : f32 to vector<8x128xf32>
    %124 = arith.maximumf %112, %123 : vector<8x128xf32>
    %125 = arith.select %15, %122, %124 : vector<8x128xi1>, vector<8x128xf32>
    %126 = vector.extract_strided_slice %125 {offsets = [0, 0], sizes = [8, 32], strides = [1, 1]} : vector<8x128xf32> to vector<8x32xf32>
    %127 = vector.extract_strided_slice %125 {offsets = [0, 32], sizes = [8, 32], strides = [1, 1]} : vector<8x128xf32> to vector<8x32xf32>
    %128 = vector.extract_strided_slice %125 {offsets = [0, 64], sizes = [8, 32], strides = [1, 1]} : vector<8x128xf32> to vector<8x32xf32>
    %129 = vector.extract_strided_slice %125 {offsets = [0, 96], sizes = [8, 32], strides = [1, 1]} : vector<8x128xf32> to vector<8x32xf32>
    %130 = arith.mulf %87, %127 : vector<8x32xf32>
    %131 = arith.mulf %126, %128 : vector<8x32xf32>
    %132 = arith.addf %130, %131 : vector<8x32xf32>
    %cst_50 = arith.constant 0.000000e+00 : f32
    %133 = vector.broadcast %cst_50 : f32 to vector<8x32xf32>
    %134 = arith.cmpf ogt, %132, %133 : vector<8x32xf32>
    %135 = math.exp %132 : vector<8x32xf32>
    %cst_51 = arith.constant 1.000000e+00 : f32
    %136 = vector.broadcast %cst_51 : f32 to vector<8x32xf32>
    %137 = arith.subf %135, %136 : vector<8x32xf32>
    %cst_52 = arith.constant 1.67326319 : f32
    %138 = vector.broadcast %cst_52 : f32 to vector<8x32xf32>
    %139 = arith.mulf %138, %137 : vector<8x32xf32>
    %140 = arith.select %134, %132, %139 : vector<8x32xi1>, vector<8x32xf32>
    %cst_53 = arith.constant 1.05070102 : f32
    %141 = vector.broadcast %cst_53 : f32 to vector<8x32xf32>
    %142 = arith.mulf %141, %140 : vector<8x32xf32>
    %143 = arith.mulf %142, %129 : vector<8x32xf32>
    %c32_i32_54 = arith.constant 32 : i32
    %144 = arith.muli %c2_i32, %c32_i32_54 : i32
    %c0_55 = arith.constant 0 : index
    %145 = arith.index_cast %144 : i32 to index
    %146 = vector.load %arg5[%c0_55, %145] : memref<8x256xf32, #tpu.memory_space<vmem>>, vector<8x32xf32>
    tpu.vector_store %arg5[%c0_55, %145], %143 {strides = array<i32>} : memref<8x256xf32, #tpu.memory_space<vmem>>, vector<8x32xf32>,
    %cst_56 = arith.constant 5.000000e-01 : f32
    %147 = vector.broadcast %cst_56 : f32 to vector<8x128xf32>
    %148 = arith.cmpf ogt, %112, %147 : vector<8x128xf32>
    %cst_57 = arith.constant 3.000000e-01 : f32
    %149 = vector.broadcast %cst_57 : f32 to vector<8x128xf32>
    %150 = arith.mulf %149, %112 : vector<8x128xf32>
    %cst_58 = arith.constant 0.000000e+00 : f32
    %151 = vector.broadcast %cst_58 : f32 to vector<8x128xf32>
    %152 = arith.select %148, %151, %150 : vector<8x128xi1>, vector<8x128xf32>
    %c3_i32 = arith.constant 3 : i32
    %c8_i32_59 = arith.constant 8 : i32
    %153 = arith.muli %c3_i32, %c8_i32_59 : i32
    %154 = tpu.assume_multiple %153, 8 : i32
    %155 = arith.index_cast %154 : i32 to index
    %c0_60 = arith.constant 0 : index
    %156 = vector.load %arg6[%155, %c0_60] : memref<64x128xf32, #tpu.memory_space<vmem>>, vector<8x128xf32>
    %157 = arith.addf %156, %152 : vector<8x128xf32>
    %cst_61 = arith.constant 0.000000e+00 : f32
    %158 = vector.broadcast %cst_61 : f32 to vector<8x128xf32>
    %159 = arith.cmpf ogt, %157, %158 : vector<8x128xf32>
    %160 = math.exp %157 : vector<8x128xf32>
    %cst_62 = arith.constant 1.000000e+00 : f32
    %161 = vector.broadcast %cst_62 : f32 to vector<8x128xf32>
    %162 = arith.subf %160, %161 : vector<8x128xf32>
    %cst_63 = arith.constant 1.67326319 : f32
    %163 = vector.broadcast %cst_63 : f32 to vector<8x128xf32>
    %164 = arith.mulf %163, %162 : vector<8x128xf32>
    %165 = arith.select %159, %157, %164 : vector<8x128xi1>, vector<8x128xf32>
    %cst_64 = arith.constant 1.05070102 : f32
    %166 = vector.broadcast %cst_64 : f32 to vector<8x128xf32>
    %167 = arith.mulf %166, %165 : vector<8x128xf32>
    %cst_65 = arith.constant 0.000000e+00 : f32
    %168 = vector.broadcast %cst_65 : f32 to vector<8x128xf32>
    %169 = arith.maximumf %157, %168 : vector<8x128xf32>
    %170 = arith.select %15, %167, %169 : vector<8x128xi1>, vector<8x128xf32>
    %171 = vector.extract_strided_slice %170 {offsets = [0, 0], sizes = [8, 32], strides = [1, 1]} : vector<8x128xf32> to vector<8x32xf32>
    %172 = vector.extract_strided_slice %170 {offsets = [0, 32], sizes = [8, 32], strides = [1, 1]} : vector<8x128xf32> to vector<8x32xf32>
    %173 = vector.extract_strided_slice %170 {offsets = [0, 64], sizes = [8, 32], strides = [1, 1]} : vector<8x128xf32> to vector<8x32xf32>
    %174 = vector.extract_strided_slice %170 {offsets = [0, 96], sizes = [8, 32], strides = [1, 1]} : vector<8x128xf32> to vector<8x32xf32>
    %175 = arith.mulf %132, %172 : vector<8x32xf32>
    %176 = arith.mulf %171, %173 : vector<8x32xf32>
    %177 = arith.addf %175, %176 : vector<8x32xf32>
    %cst_66 = arith.constant 0.000000e+00 : f32
    %178 = vector.broadcast %cst_66 : f32 to vector<8x32xf32>
    %179 = arith.cmpf ogt, %177, %178 : vector<8x32xf32>
    %180 = math.exp %177 : vector<8x32xf32>
    %cst_67 = arith.constant 1.000000e+00 : f32
    %181 = vector.broadcast %cst_67 : f32 to vector<8x32xf32>
    %182 = arith.subf %180, %181 : vector<8x32xf32>
    %cst_68 = arith.constant 1.67326319 : f32
    %183 = vector.broadcast %cst_68 : f32 to vector<8x32xf32>
    %184 = arith.mulf %183, %182 : vector<8x32xf32>
    %185 = arith.select %179, %177, %184 : vector<8x32xi1>, vector<8x32xf32>
    %cst_69 = arith.constant 1.05070102 : f32
    %186 = vector.broadcast %cst_69 : f32 to vector<8x32xf32>
    %187 = arith.mulf %186, %185 : vector<8x32xf32>
    %188 = arith.mulf %187, %174 : vector<8x32xf32>
    %c32_i32_70 = arith.constant 32 : i32
    %189 = arith.muli %c3_i32, %c32_i32_70 : i32
    %c0_71 = arith.constant 0 : index
    %190 = arith.index_cast %189 : i32 to index
    %191 = vector.load %arg5[%c0_71, %190] : memref<8x256xf32, #tpu.memory_space<vmem>>, vector<8x32xf32>
    tpu.vector_store %arg5[%c0_71, %190], %188 {strides = array<i32>} : memref<8x256xf32, #tpu.memory_space<vmem>>, vector<8x32xf32>,
    %cst_72 = arith.constant 5.000000e-01 : f32
    %192 = vector.broadcast %cst_72 : f32 to vector<8x128xf32>
    %193 = arith.cmpf ogt, %157, %192 : vector<8x128xf32>
    %cst_73 = arith.constant 3.000000e-01 : f32
    %194 = vector.broadcast %cst_73 : f32 to vector<8x128xf32>
    %195 = arith.mulf %194, %157 : vector<8x128xf32>
    %cst_74 = arith.constant 0.000000e+00 : f32
    %196 = vector.broadcast %cst_74 : f32 to vector<8x128xf32>
    %197 = arith.select %193, %196, %195 : vector<8x128xi1>, vector<8x128xf32>
    %c4_i32 = arith.constant 4 : i32
    %c8_i32_75 = arith.constant 8 : i32
    %198 = arith.muli %c4_i32, %c8_i32_75 : i32
    %199 = tpu.assume_multiple %198, 8 : i32
    %200 = arith.index_cast %199 : i32 to index
    %c0_76 = arith.constant 0 : index
    %201 = vector.load %arg6[%200, %c0_76] : memref<64x128xf32, #tpu.memory_space<vmem>>, vector<8x128xf32>
    %202 = arith.addf %201, %197 : vector<8x128xf32>
    %cst_77 = arith.constant 0.000000e+00 : f32
    %203 = vector.broadcast %cst_77 : f32 to vector<8x128xf32>
    %204 = arith.cmpf ogt, %202, %203 : vector<8x128xf32>
    %205 = math.exp %202 : vector<8x128xf32>
    %cst_78 = arith.constant 1.000000e+00 : f32
    %206 = vector.broadcast %cst_78 : f32 to vector<8x128xf32>
    %207 = arith.subf %205, %206 : vector<8x128xf32>
    %cst_79 = arith.constant 1.67326319 : f32
    %208 = vector.broadcast %cst_79 : f32 to vector<8x128xf32>
    %209 = arith.mulf %208, %207 : vector<8x128xf32>
    %210 = arith.select %204, %202, %209 : vector<8x128xi1>, vector<8x128xf32>
    %cst_80 = arith.constant 1.05070102 : f32
    %211 = vector.broadcast %cst_80 : f32 to vector<8x128xf32>
    %212 = arith.mulf %211, %210 : vector<8x128xf32>
    %cst_81 = arith.constant 0.000000e+00 : f32
    %213 = vector.broadcast %cst_81 : f32 to vector<8x128xf32>
    %214 = arith.maximumf %202, %213 : vector<8x128xf32>
    %215 = arith.select %15, %212, %214 : vector<8x128xi1>, vector<8x128xf32>
    %216 = vector.extract_strided_slice %215 {offsets = [0, 0], sizes = [8, 32], strides = [1, 1]} : vector<8x128xf32> to vector<8x32xf32>
    %217 = vector.extract_strided_slice %215 {offsets = [0, 32], sizes = [8, 32], strides = [1, 1]} : vector<8x128xf32> to vector<8x32xf32>
    %218 = vector.extract_strided_slice %215 {offsets = [0, 64], sizes = [8, 32], strides = [1, 1]} : vector<8x128xf32> to vector<8x32xf32>
    %219 = vector.extract_strided_slice %215 {offsets = [0, 96], sizes = [8, 32], strides = [1, 1]} : vector<8x128xf32> to vector<8x32xf32>
    %220 = arith.mulf %177, %217 : vector<8x32xf32>
    %221 = arith.mulf %216, %218 : vector<8x32xf32>
    %222 = arith.addf %220, %221 : vector<8x32xf32>
    %cst_82 = arith.constant 0.000000e+00 : f32
    %223 = vector.broadcast %cst_82 : f32 to vector<8x32xf32>
    %224 = arith.cmpf ogt, %222, %223 : vector<8x32xf32>
    %225 = math.exp %222 : vector<8x32xf32>
    %cst_83 = arith.constant 1.000000e+00 : f32
    %226 = vector.broadcast %cst_83 : f32 to vector<8x32xf32>
    %227 = arith.subf %225, %226 : vector<8x32xf32>
    %cst_84 = arith.constant 1.67326319 : f32
    %228 = vector.broadcast %cst_84 : f32 to vector<8x32xf32>
    %229 = arith.mulf %228, %227 : vector<8x32xf32>
    %230 = arith.select %224, %222, %229 : vector<8x32xi1>, vector<8x32xf32>
    %cst_85 = arith.constant 1.05070102 : f32
    %231 = vector.broadcast %cst_85 : f32 to vector<8x32xf32>
    %232 = arith.mulf %231, %230 : vector<8x32xf32>
    %233 = arith.mulf %232, %219 : vector<8x32xf32>
    %c32_i32_86 = arith.constant 32 : i32
    %234 = arith.muli %c4_i32, %c32_i32_86 : i32
    %c0_87 = arith.constant 0 : index
    %235 = arith.index_cast %234 : i32 to index
    %236 = vector.load %arg5[%c0_87, %235] : memref<8x256xf32, #tpu.memory_space<vmem>>, vector<8x32xf32>
    tpu.vector_store %arg5[%c0_87, %235], %233 {strides = array<i32>} : memref<8x256xf32, #tpu.memory_space<vmem>>, vector<8x32xf32>,
    %cst_88 = arith.constant 5.000000e-01 : f32
    %237 = vector.broadcast %cst_88 : f32 to vector<8x128xf32>
    %238 = arith.cmpf ogt, %202, %237 : vector<8x128xf32>
    %cst_89 = arith.constant 3.000000e-01 : f32
    %239 = vector.broadcast %cst_89 : f32 to vector<8x128xf32>
    %240 = arith.mulf %239, %202 : vector<8x128xf32>
    %cst_90 = arith.constant 0.000000e+00 : f32
    %241 = vector.broadcast %cst_90 : f32 to vector<8x128xf32>
    %242 = arith.select %238, %241, %240 : vector<8x128xi1>, vector<8x128xf32>
    %c5_i32 = arith.constant 5 : i32
    %c8_i32_91 = arith.constant 8 : i32
    %243 = arith.muli %c5_i32, %c8_i32_91 : i32
    %244 = tpu.assume_multiple %243, 8 : i32
    %245 = arith.index_cast %244 : i32 to index
    %c0_92 = arith.constant 0 : index
    %246 = vector.load %arg6[%245, %c0_92] : memref<64x128xf32, #tpu.memory_space<vmem>>, vector<8x128xf32>
    %247 = arith.addf %246, %242 : vector<8x128xf32>
    %cst_93 = arith.constant 0.000000e+00 : f32
    %248 = vector.broadcast %cst_93 : f32 to vector<8x128xf32>
    %249 = arith.cmpf ogt, %247, %248 : vector<8x128xf32>
    %250 = math.exp %247 : vector<8x128xf32>
    %cst_94 = arith.constant 1.000000e+00 : f32
    %251 = vector.broadcast %cst_94 : f32 to vector<8x128xf32>
    %252 = arith.subf %250, %251 : vector<8x128xf32>
    %cst_95 = arith.constant 1.67326319 : f32
    %253 = vector.broadcast %cst_95 : f32 to vector<8x128xf32>
    %254 = arith.mulf %253, %252 : vector<8x128xf32>
    %255 = arith.select %249, %247, %254 : vector<8x128xi1>, vector<8x128xf32>
    %cst_96 = arith.constant 1.05070102 : f32
    %256 = vector.broadcast %cst_96 : f32 to vector<8x128xf32>
    %257 = arith.mulf %256, %255 : vector<8x128xf32>
    %cst_97 = arith.constant 0.000000e+00 : f32
    %258 = vector.broadcast %cst_97 : f32 to vector<8x128xf32>
    %259 = arith.maximumf %247, %258 : vector<8x128xf32>
    %260 = arith.select %15, %257, %259 : vector<8x128xi1>, vector<8x128xf32>
    %261 = vector.extract_strided_slice %260 {offsets = [0, 0], sizes = [8, 32], strides = [1, 1]} : vector<8x128xf32> to vector<8x32xf32>
    %262 = vector.extract_strided_slice %260 {offsets = [0, 32], sizes = [8, 32], strides = [1, 1]} : vector<8x128xf32> to vector<8x32xf32>
    %263 = vector.extract_strided_slice %260 {offsets = [0, 64], sizes = [8, 32], strides = [1, 1]} : vector<8x128xf32> to vector<8x32xf32>
    %264 = vector.extract_strided_slice %260 {offsets = [0, 96], sizes = [8, 32], strides = [1, 1]} : vector<8x128xf32> to vector<8x32xf32>
    %265 = arith.mulf %222, %262 : vector<8x32xf32>
    %266 = arith.mulf %261, %263 : vector<8x32xf32>
    %267 = arith.addf %265, %266 : vector<8x32xf32>
    %cst_98 = arith.constant 0.000000e+00 : f32
    %268 = vector.broadcast %cst_98 : f32 to vector<8x32xf32>
    %269 = arith.cmpf ogt, %267, %268 : vector<8x32xf32>
    %270 = math.exp %267 : vector<8x32xf32>
    %cst_99 = arith.constant 1.000000e+00 : f32
    %271 = vector.broadcast %cst_99 : f32 to vector<8x32xf32>
    %272 = arith.subf %270, %271 : vector<8x32xf32>
    %cst_100 = arith.constant 1.67326319 : f32
    %273 = vector.broadcast %cst_100 : f32 to vector<8x32xf32>
    %274 = arith.mulf %273, %272 : vector<8x32xf32>
    %275 = arith.select %269, %267, %274 : vector<8x32xi1>, vector<8x32xf32>
    %cst_101 = arith.constant 1.05070102 : f32
    %276 = vector.broadcast %cst_101 : f32 to vector<8x32xf32>
    %277 = arith.mulf %276, %275 : vector<8x32xf32>
    %278 = arith.mulf %277, %264 : vector<8x32xf32>
    %c32_i32_102 = arith.constant 32 : i32
    %279 = arith.muli %c5_i32, %c32_i32_102 : i32
    %c0_103 = arith.constant 0 : index
    %280 = arith.index_cast %279 : i32 to index
    %281 = vector.load %arg5[%c0_103, %280] : memref<8x256xf32, #tpu.memory_space<vmem>>, vector<8x32xf32>
    tpu.vector_store %arg5[%c0_103, %280], %278 {strides = array<i32>} : memref<8x256xf32, #tpu.memory_space<vmem>>, vector<8x32xf32>,
    %cst_104 = arith.constant 5.000000e-01 : f32
    %282 = vector.broadcast %cst_104 : f32 to vector<8x128xf32>
    %283 = arith.cmpf ogt, %247, %282 : vector<8x128xf32>
    %cst_105 = arith.constant 3.000000e-01 : f32
    %284 = vector.broadcast %cst_105 : f32 to vector<8x128xf32>
    %285 = arith.mulf %284, %247 : vector<8x128xf32>
    %cst_106 = arith.constant 0.000000e+00 : f32
    %286 = vector.broadcast %cst_106 : f32 to vector<8x128xf32>
    %287 = arith.select %283, %286, %285 : vector<8x128xi1>, vector<8x128xf32>
    %c6_i32 = arith.constant 6 : i32
    %c8_i32_107 = arith.constant 8 : i32
    %288 = arith.muli %c6_i32, %c8_i32_107 : i32
    %289 = tpu.assume_multiple %288, 8 : i32
    %290 = arith.index_cast %289 : i32 to index
    %c0_108 = arith.constant 0 : index
    %291 = vector.load %arg6[%290, %c0_108] : memref<64x128xf32, #tpu.memory_space<vmem>>, vector<8x128xf32>
    %292 = arith.addf %291, %287 : vector<8x128xf32>
    %cst_109 = arith.constant 0.000000e+00 : f32
    %293 = vector.broadcast %cst_109 : f32 to vector<8x128xf32>
    %294 = arith.cmpf ogt, %292, %293 : vector<8x128xf32>
    %295 = math.exp %292 : vector<8x128xf32>
    %cst_110 = arith.constant 1.000000e+00 : f32
    %296 = vector.broadcast %cst_110 : f32 to vector<8x128xf32>
    %297 = arith.subf %295, %296 : vector<8x128xf32>
    %cst_111 = arith.constant 1.67326319 : f32
    %298 = vector.broadcast %cst_111 : f32 to vector<8x128xf32>
    %299 = arith.mulf %298, %297 : vector<8x128xf32>
    %300 = arith.select %294, %292, %299 : vector<8x128xi1>, vector<8x128xf32>
    %cst_112 = arith.constant 1.05070102 : f32
    %301 = vector.broadcast %cst_112 : f32 to vector<8x128xf32>
    %302 = arith.mulf %301, %300 : vector<8x128xf32>
    %cst_113 = arith.constant 0.000000e+00 : f32
    %303 = vector.broadcast %cst_113 : f32 to vector<8x128xf32>
    %304 = arith.maximumf %292, %303 : vector<8x128xf32>
    %305 = arith.select %15, %302, %304 : vector<8x128xi1>, vector<8x128xf32>
    %306 = vector.extract_strided_slice %305 {offsets = [0, 0], sizes = [8, 32], strides = [1, 1]} : vector<8x128xf32> to vector<8x32xf32>
    %307 = vector.extract_strided_slice %305 {offsets = [0, 32], sizes = [8, 32], strides = [1, 1]} : vector<8x128xf32> to vector<8x32xf32>
    %308 = vector.extract_strided_slice %305 {offsets = [0, 64], sizes = [8, 32], strides = [1, 1]} : vector<8x128xf32> to vector<8x32xf32>
    %309 = vector.extract_strided_slice %305 {offsets = [0, 96], sizes = [8, 32], strides = [1, 1]} : vector<8x128xf32> to vector<8x32xf32>
    %310 = arith.mulf %267, %307 : vector<8x32xf32>
    %311 = arith.mulf %306, %308 : vector<8x32xf32>
    %312 = arith.addf %310, %311 : vector<8x32xf32>
    %cst_114 = arith.constant 0.000000e+00 : f32
    %313 = vector.broadcast %cst_114 : f32 to vector<8x32xf32>
    %314 = arith.cmpf ogt, %312, %313 : vector<8x32xf32>
    %315 = math.exp %312 : vector<8x32xf32>
    %cst_115 = arith.constant 1.000000e+00 : f32
    %316 = vector.broadcast %cst_115 : f32 to vector<8x32xf32>
    %317 = arith.subf %315, %316 : vector<8x32xf32>
    %cst_116 = arith.constant 1.67326319 : f32
    %318 = vector.broadcast %cst_116 : f32 to vector<8x32xf32>
    %319 = arith.mulf %318, %317 : vector<8x32xf32>
    %320 = arith.select %314, %312, %319 : vector<8x32xi1>, vector<8x32xf32>
    %cst_117 = arith.constant 1.05070102 : f32
    %321 = vector.broadcast %cst_117 : f32 to vector<8x32xf32>
    %322 = arith.mulf %321, %320 : vector<8x32xf32>
    %323 = arith.mulf %322, %309 : vector<8x32xf32>
    %c32_i32_118 = arith.constant 32 : i32
    %324 = arith.muli %c6_i32, %c32_i32_118 : i32
    %c0_119 = arith.constant 0 : index
    %325 = arith.index_cast %324 : i32 to index
    %326 = vector.load %arg5[%c0_119, %325] : memref<8x256xf32, #tpu.memory_space<vmem>>, vector<8x32xf32>
    tpu.vector_store %arg5[%c0_119, %325], %323 {strides = array<i32>} : memref<8x256xf32, #tpu.memory_space<vmem>>, vector<8x32xf32>,
    %cst_120 = arith.constant 5.000000e-01 : f32
    %327 = vector.broadcast %cst_120 : f32 to vector<8x128xf32>
    %328 = arith.cmpf ogt, %292, %327 : vector<8x128xf32>
    %cst_121 = arith.constant 3.000000e-01 : f32
    %329 = vector.broadcast %cst_121 : f32 to vector<8x128xf32>
    %330 = arith.mulf %329, %292 : vector<8x128xf32>
    %cst_122 = arith.constant 0.000000e+00 : f32
    %331 = vector.broadcast %cst_122 : f32 to vector<8x128xf32>
    %332 = arith.select %328, %331, %330 : vector<8x128xi1>, vector<8x128xf32>
    %c7_i32 = arith.constant 7 : i32
    %c8_i32_123 = arith.constant 8 : i32
    %333 = arith.muli %c7_i32, %c8_i32_123 : i32
    %334 = tpu.assume_multiple %333, 8 : i32
    %335 = arith.index_cast %334 : i32 to index
    %c0_124 = arith.constant 0 : index
    %336 = vector.load %arg6[%335, %c0_124] : memref<64x128xf32, #tpu.memory_space<vmem>>, vector<8x128xf32>
    %337 = arith.addf %336, %332 : vector<8x128xf32>
    %cst_125 = arith.constant 0.000000e+00 : f32
    %338 = vector.broadcast %cst_125 : f32 to vector<8x128xf32>
    %339 = arith.cmpf ogt, %337, %338 : vector<8x128xf32>
    %340 = math.exp %337 : vector<8x128xf32>
    %cst_126 = arith.constant 1.000000e+00 : f32
    %341 = vector.broadcast %cst_126 : f32 to vector<8x128xf32>
    %342 = arith.subf %340, %341 : vector<8x128xf32>
    %cst_127 = arith.constant 1.67326319 : f32
    %343 = vector.broadcast %cst_127 : f32 to vector<8x128xf32>
    %344 = arith.mulf %343, %342 : vector<8x128xf32>
    %345 = arith.select %339, %337, %344 : vector<8x128xi1>, vector<8x128xf32>
    %cst_128 = arith.constant 1.05070102 : f32
    %346 = vector.broadcast %cst_128 : f32 to vector<8x128xf32>
    %347 = arith.mulf %346, %345 : vector<8x128xf32>
    %cst_129 = arith.constant 0.000000e+00 : f32
    %348 = vector.broadcast %cst_129 : f32 to vector<8x128xf32>
    %349 = arith.maximumf %337, %348 : vector<8x128xf32>
    %350 = arith.select %15, %347, %349 : vector<8x128xi1>, vector<8x128xf32>
    %351 = vector.extract_strided_slice %350 {offsets = [0, 0], sizes = [8, 32], strides = [1, 1]} : vector<8x128xf32> to vector<8x32xf32>
    %352 = vector.extract_strided_slice %350 {offsets = [0, 32], sizes = [8, 32], strides = [1, 1]} : vector<8x128xf32> to vector<8x32xf32>
    %353 = vector.extract_strided_slice %350 {offsets = [0, 64], sizes = [8, 32], strides = [1, 1]} : vector<8x128xf32> to vector<8x32xf32>
    %354 = vector.extract_strided_slice %350 {offsets = [0, 96], sizes = [8, 32], strides = [1, 1]} : vector<8x128xf32> to vector<8x32xf32>
    %355 = arith.mulf %312, %352 : vector<8x32xf32>
    %356 = arith.mulf %351, %353 : vector<8x32xf32>
    %357 = arith.addf %355, %356 : vector<8x32xf32>
    %cst_130 = arith.constant 0.000000e+00 : f32
    %358 = vector.broadcast %cst_130 : f32 to vector<8x32xf32>
    %359 = arith.cmpf ogt, %357, %358 : vector<8x32xf32>
    %360 = math.exp %357 : vector<8x32xf32>
    %cst_131 = arith.constant 1.000000e+00 : f32
    %361 = vector.broadcast %cst_131 : f32 to vector<8x32xf32>
    %362 = arith.subf %360, %361 : vector<8x32xf32>
    %cst_132 = arith.constant 1.67326319 : f32
    %363 = vector.broadcast %cst_132 : f32 to vector<8x32xf32>
    %364 = arith.mulf %363, %362 : vector<8x32xf32>
    %365 = arith.select %359, %357, %364 : vector<8x32xi1>, vector<8x32xf32>
    %cst_133 = arith.constant 1.05070102 : f32
    %366 = vector.broadcast %cst_133 : f32 to vector<8x32xf32>
    %367 = arith.mulf %366, %365 : vector<8x32xf32>
    %368 = arith.mulf %367, %354 : vector<8x32xf32>
    %c32_i32_134 = arith.constant 32 : i32
    %369 = arith.muli %c7_i32, %c32_i32_134 : i32
    %c0_135 = arith.constant 0 : index
    %370 = arith.index_cast %369 : i32 to index
    %371 = vector.load %arg5[%c0_135, %370] : memref<8x256xf32, #tpu.memory_space<vmem>>, vector<8x32xf32>
    tpu.vector_store %arg5[%c0_135, %370], %368 {strides = array<i32>} : memref<8x256xf32, #tpu.memory_space<vmem>>, vector<8x32xf32>,
    %cst_136 = arith.constant 5.000000e-01 : f32
    %372 = vector.broadcast %cst_136 : f32 to vector<8x128xf32>
    %373 = arith.cmpf ogt, %337, %372 : vector<8x128xf32>
    %cst_137 = arith.constant 3.000000e-01 : f32
    %374 = vector.broadcast %cst_137 : f32 to vector<8x128xf32>
    %375 = arith.mulf %374, %337 : vector<8x128xf32>
    %cst_138 = arith.constant 0.000000e+00 : f32
    %376 = vector.broadcast %cst_138 : f32 to vector<8x128xf32>
    %377 = arith.select %373, %376, %375 : vector<8x128xi1>, vector<8x128xf32>
    %c8_i32_139 = arith.constant 8 : i32
    %c0_140 = arith.constant 0 : index
    %c0_141 = arith.constant 0 : index
    %378 = vector.load %arg7[%c0_140, %c0_141] : memref<8x128xf32, #tpu.memory_space<vmem>>, vector<8x128xf32>
    tpu.vector_store %arg7[%c0_140, %c0_141], %377 {strides = array<i32>} : memref<8x128xf32, #tpu.memory_space<vmem>>, vector<8x128xf32>,
    %c0_142 = arith.constant 0 : index
    %c0_143 = arith.constant 0 : index
    %379 = vector.load %arg8[%c0_142, %c0_143] : memref<8x32xf32, #tpu.memory_space<vmem>>, vector<8x32xf32>
    tpu.vector_store %arg8[%c0_142, %c0_143], %357 {strides = array<i32>} : memref<8x32xf32, #tpu.memory_space<vmem>>, vector<8x32xf32>,
    return
  }
  func.func @transform_0(%arg0: i32, %arg1: i32) -> (i32, i32) {
    %c1_i32 = arith.constant 1 : i32
    %0 = arith.muli %arg0, %c1_i32 : i32
    %1 = arith.addi %0, %arg1 : i32
    %c0_i32 = arith.constant 0 : i32
    %c0_i32_0 = arith.constant 0 : i32
    return %1, %c0_i32 : i32, i32
  }
  func.func @transform_1(%arg0: i32, %arg1: i32) -> (i32, i32) {
    %c0_i32 = arith.constant 0 : i32
    %c0_i32_0 = arith.constant 0 : i32
    %c0_i32_1 = arith.constant 0 : i32
    return %c0_i32, %c0_i32_0 : i32, i32
  }
  func.func @transform_2(%arg0: i32, %arg1: i32) -> (i32, i32) {
    %c0_i32 = arith.constant 0 : i32
    %c0_i32_0 = arith.constant 0 : i32
    %c0_i32_1 = arith.constant 0 : i32
    return %c0_i32, %c0_i32_0 : i32, i32
  }
  func.func @transform_3(%arg0: i32, %arg1: i32) -> (i32, i32) {
    %c0_i32 = arith.constant 0 : i32
    return %arg0, %arg1 : i32, i32
  }
}

</mosaic_0001>

<bundles_post_ra>
// kernel: liaf_lstm_cell.1
= control target key start
LH: loop header
LB: loop body
LE: loop exit
PB: predicated region body
PF: predicated region fallthrough
CT: control target
= control target key end

     0   :  { %vm87_vm0 = vcmask 130048   ;;  %vm42_vm1 = vcmask 261120   ;;  %v599_v5 = vmov 0.0   ;;  %v173_v23 = vlaneseq  ;;  %s602_s23 = smov 32   ;;  %s849_s1 = inlined_call_operand.vmem [shape: bf16[16,128], index: 1, kind: input, shape index: {}]   ;;  %s850_s0 = inlined_call_operand.vmem [shape: bf16[64,16], index: 0, kind: input, shape index: {}]   ;;  %s851_s2 = inlined_call_operand.vmem [shape: f32[1,128], index: 2, kind: input, shape index: {}]   ;;  %s852_s3 = inlined_call_operand.vmem [shape: f32[8,256], index: 3, kind: output, shape index: {}]  }
   0x1   :  { %v562_v0 = vld [vmem:[%s849_s1] sm:$0xff]   ;;  %v564_v2 = vld [vmem:[%s850_s0 + $0x8] sm:$0xff]   ;;  %v565_v3 = vld [vmem:[%s850_s0 + $0x10] sm:$0xff]   ;;  %43 = vst.msk [vmem:[#allocation4] sm:$0xff] %vm42_vm1, %v599_v5 }
   0x2   :  { %v563_v1 = vld [vmem:[%s850_s0] sm:$0xff]   ;;  %546 = vmatprep.subr.bf16.mxu0 %v562_v0  ;;  %556 = vmatprep.subr.bf16.mxu1 %v562_v0  ;;  %v566_v4 = vld [vmem:[%s850_s0 + $0x18] sm:$0xff]   ;;  %v174_v30 = vand.u32 127, %v173_v23  ;;  %s600_s0 = smov 96  }
   0x3   :  { %547 = vmatpush3.bf16.msra.mxu0 %v562_v0  ;;  %548 = vmatprep.mubr.msk.bf16.mxu0 %vm87_vm0, %v563_v1  ;;  %v642_v7 = vld [vmem:[%s851_s2] ss:$0 sm:$0xff]  ;;  %s601_s2 = smov 64  }
   0x4   :  { %557 = vmatpush3.bf16.msra.mxu1 %v562_v0  ;;  %552 = vmatprep.mubr.msk.bf16.mxu1 %vm87_vm0, %v565_v3  ;;  %vm175_vm6 = vcmp.ge.s32.totalorder %v174_v30, 64  ;;  %vm176_vm7 = vcmp.lt.s32.totalorder %v174_v30, 96 }
   0x5   :  { %vm668_vm10 = vmand %vm175_vm6, %vm176_vm7 }
   0x6   :  { %549 = vmatmul.mubr.msk.bf16.vlgmr.msra.gmra.mxu0 %vm87_vm0, %v564_v2 }
   0x7   :  { %553 = vmatmul.mubr.msk.bf16.vlgmr.msra.gmra.mxu1 %vm87_vm0, %v566_v4 }
  0xc6   :  { %v550_v6 = vpop.f32.mrf.mxu0 }
  0xc7   :  { %v143_v19 = vadd.f32 %v550_v6, %v642_v7  ;;  %v554_v20 = vpop.f32.mrf.mxu1 }
  0xc8   :  { %v134_v8 = vpop.f32.mrf.mxu0  ;;  %v159_v55 = vadd.f32 %v554_v20, %v642_v7 }
  0xc9   :  { %v135_v9 = vadd.f32 %v642_v7, %v134_v8  ;;  %v150_v24 = vpop.f32.mrf.mxu1 }
  0xca   :  { %v551_v10 = vpop.f32.mrf.mxu0  ;;  %v151_v35 = vadd.f32 %v642_v7, %v150_v24 }
  0xcb   :  { %vm214_vm2 = vcmp.gt.f32.partialorder %v135_v9, 0.5  ;;  %v215_v11 = vmul.f32 0.3, %v135_v9  ;;  %v183_v13 = vmul.f32 1.442695, %v135_v9  ;;  %v146_v27 = vadd.f32 %v551_v10, %v642_v7  ;;  %v555_v31 = vpop.f32.mrf.mxu1 }
  0xcc   :  { %v137_v12 = vpop.f32.mrf.mxu0  ;;  %vm182_vm8 = vcmp.gt.f32.partialorder %v135_v9, 0.0  ;;  %v189_v45 = vmax.f32 %v135_v9, 0.0  ;;  %v162_v10 = vadd.f32 %v555_v31, %v642_v7 }
  0xcd   :  { %v138_v14 = vadd.f32 %v642_v7, %v137_v12  ;;  %v216_v15 = vsel %vm214_vm2, 0.0, %v215_v11  ;;  %567 = vpow2.f32 %v183_v13  ;;  %v153_v39 = vpop.f32.mrf.mxu1 }
  0xce   :  { %v154_v46 = vadd.f32 %v642_v7, %v153_v39 }
  0xcf   :  { %v646_v16 = vadd.f32 %v216_v15, %v138_v14 }
  0xd1   :  { %vm256_vm3 = vcmp.gt.f32.partialorder %v646_v16, 0.5  ;;  %v257_v17 = vmul.f32 0.3, %v646_v16  ;;  %v221_v18 = vmul.f32 1.442695, %v646_v16  ;;  %vm220_vm11 = vcmp.gt.f32.partialorder %v646_v16, 0.0 }
  0xd2   :  { %v227_v59 = vmax.f32 %v646_v16, 0.0 }
  0xd3   :  { %v258_v21 = vsel %vm256_vm3, 0.0, %v257_v17  ;;  %569 = vpow2.f32 %v221_v18 }
  0xd4   :  { %v652_v22 = vadd.f32 %v258_v21, %v143_v19 }
  0xd6   :  { %vm298_vm4 = vcmp.gt.f32.partialorder %v652_v22, 0.5  ;;  %v299_v25 = vmul.f32 0.3, %v652_v22  ;;  %v263_v26 = vmul.f32 1.442695, %v652_v22  ;;  %vm262_vm13 = vcmp.gt.f32.partialorder %v652_v22, 0.0 }
  0xd7   :  { %v269_v4 = vmax.f32 %v652_v22, 0.0 }
  0xd8   :  { %v300_v28 = vsel %vm298_vm4, 0.0, %v299_v25  ;;  %571 = vpow2.f32 %v263_v26 }
  0xd9   :  { %v658_v29 = vadd.f32 %v300_v28, %v146_v27 }
  0xda   :  { %v568_v32 = vpop.eup %567 }
  0xdb   :  { %vm340_vm5 = vcmp.gt.f32.partialorder %v658_v29, 0.5  ;;  %v341_v33 = vmul.f32 0.3, %v658_v29  ;;  %v305_v34 = vmul.f32 1.442695, %v658_v29  ;;  %v525_v36 = vadd.f32 -1.0, %v568_v32 }
  0xdc   :  { %vm304_vm15 = vcmp.gt.f32.partialorder %v658_v29, 0.0  ;;  %v311_v17 = vmax.f32 %v658_v29, 0.0 }
  0xdd   :  { %v342_v37 = vsel %vm340_vm5, 0.0, %v341_v33  ;;  %573 = vpow2.f32 %v305_v34  ;;  %v186_v40 = vmul.f32 1.6732632, %v525_v36 }
  0xde   :  { %v664_v38 = vadd.f32 %v342_v37, %v151_v35 }
  0xdf   :  { %v187_v44 = vsel %vm182_vm8, %v135_v9, %v186_v40 }
  0xe0   :  { %v570_v41 = vpop.eup %569  ;;  %vm377_vm9 = vcmp.gt.f32.partialorder %v664_v38, 0.5  ;;  %v378_v42 = vmul.f32 0.3, %v664_v38  ;;  %v188_v47 = vmul.f32 1.050701, %v187_v44  ;;  %vm346_vm0 = vcmp.gt.f32.partialorder %v664_v38, 0.0 }
  0xe1   :  { %v527_v48 = vadd.f32 -1.0, %v570_v41  ;;  %v347_v49 = vmul.f32 1.442695, %v664_v38  ;;  %v353_v25 = vmax.f32 %v664_v38, 0.0 }
  0xe2   :  { %v379_v50 = vsel %vm377_vm9, 0.0, %v378_v42  ;;  %v678_v52 = vsel %vm668_vm10, %v188_v47, %v189_v45 }
  0xe3   :  { %v674_v51 = vadd.f32 %v379_v50, %v154_v46  ;;  %v224_v53 = vmul.f32 1.6732632, %v527_v48  ;;  %575 = vpow2.f32 %v347_v49  ;;  %192 = vrot.lane.b32.xlu0 %v678_v52, %s600_s0  ;;  %v179_v48 = vld [vmem:[#allocation4] sm:$0xff] }
  0xe5   :  { %v572_v54 = vpop.eup %571  ;;  %vm418_vm12 = vcmp.gt.f32.partialorder %v674_v51, 0.5  ;;  %v419_v56 = vmul.f32 0.3, %v674_v51  ;;  %v225_v57 = vsel %vm220_vm11, %v646_v16, %v224_v53  ;;  %v384_v61 = vmul.f32 1.442695, %v674_v51 }
  0xe6   :  { %v226_v58 = vmul.f32 1.050701, %v225_v57  ;;  %v529_v60 = vadd.f32 -1.0, %v572_v54  ;;  %vm383_vm2 = vcmp.gt.f32.partialorder %v674_v51, 0.0  ;;  %v390_v33 = vmax.f32 %v674_v51, 0.0 }
  0xe7   :  { %v420_v62 = vsel %vm418_vm12, 0.0, %v419_v56  ;;  %196 = vrot.lane.b32.xlu0 %v678_v52, %s601_s2  ;;  %577 = vpow2.f32 %v384_v61 }
  0xe8   :  { %v689_v63 = vadd.f32 %v420_v62, %v159_v55  ;;  %v695_v0 = vsel %vm668_vm10, %v226_v58, %v227_v59  ;;  %v266_v1 = vmul.f32 1.6732632, %v529_v60 }
  0xe9   :  { %230 = vrot.lane.b32.xlu1 %v695_v0, %s600_s0 }
  0xea   :  { %v574_v2 = vpop.eup %573  ;;  %v267_v3 = vsel %vm262_vm13, %v652_v22, %v266_v1  ;;  %v425_v5 = vmul.f32 1.442695, %v689_v63  ;;  %vm459_vm14 = vcmp.gt.f32.partialorder %v689_v63, 0.5  ;;  %v460_v9 = vmul.f32 0.3, %v689_v63 }
  0xeb   :  { %v268_v6 = vmul.f32 1.050701, %v267_v3  ;;  %v531_v8 = vadd.f32 -1.0, %v574_v2  ;;  %vm424_vm3 = vcmp.gt.f32.partialorder %v689_v63, 0.0  ;;  %v431_v39 = vmax.f32 %v689_v63, 0.0 }
  0xec   :  { %579 = vpow2.f32 %v425_v5  ;;  %v461_v13 = vsel %vm459_vm14, 0.0, %v460_v9  ;;  %vm254_vm13 = vcmask 523520   ;;  %vm338_vm14 = vcmask 1048320  }
  0xed   :  { %234 = vrot.lane.b32.xlu1 %v695_v0, %s601_s2  ;;  %v710_v11 = vsel %vm668_vm10, %v268_v6, %v269_v4  ;;  %v308_v12 = vmul.f32 1.6732632, %v531_v8  ;;  %v464_v14 = vadd.f32 %v461_v13, %v162_v10 }
  0xee   :  { %272 = vrot.lane.b32.xlu0 %v710_v11, %s600_s0 }
  0xef   :  { %v309_v15 = vsel %vm304_vm15, %v658_v29, %v308_v12  ;;  %v466_v18 = vmul.f32 1.442695, %v464_v14  ;;  %vm465_vm4 = vcmp.gt.f32.partialorder %v464_v14, 0.0  ;;  %v472_v46 = vmax.f32 %v464_v14, 0.0 }
  0xf0   :  { %v576_v16 = vpop.eup %575  ;;  %v310_v7 = vmul.f32 1.050701, %v309_v15 }
  0xf1   :  { %276 = vrot.lane.b32.xlu1 %v710_v11, %s601_s2  ;;  %v533_v19 = vadd.f32 -1.0, %v576_v16  ;;  %581 = vpow2.f32 %v466_v18 }
  0xf2   :  { %v721_v20 = vsel %vm668_vm10, %v310_v7, %v311_v17 }
  0xf3   :  { %314 = vrot.lane.b32.xlu0 %v721_v20, %s600_s0  ;;  %v350_v21 = vmul.f32 1.6732632, %v533_v19 }
  0xf4   :  { %v578_v22 = vpop.eup %577 }
  0xf5   :  { %318 = vrot.lane.b32.xlu1 %v721_v20, %s601_s2  ;;  %v351_v23 = vsel %vm346_vm0, %v664_v38, %v350_v21  ;;  %v535_v26 = vadd.f32 -1.0, %v578_v22 }
  0xf6   :  { %v352_v24 = vmul.f32 1.050701, %v351_v23 }
  0xf7   :  { %v387_v28 = vmul.f32 1.6732632, %v535_v26 }
  0xf8   :  { %v732_v27 = vsel %vm668_vm10, %v352_v24, %v353_v25 }
  0xf9   :  { %v580_v29 = vpop.eup %579  ;;  %356 = vrot.lane.b32.xlu0 %v732_v27, %s600_s0  ;;  %360 = vrot.lane.b32.xlu1 %v732_v27, %s601_s2  ;;  %v388_v30 = vsel %vm383_vm2, %v674_v51, %v387_v28 }
  0xfa   :  { %v537_v31 = vadd.f32 -1.0, %v580_v29  ;;  %v389_v32 = vmul.f32 1.050701, %v388_v30 }
  0xfc   :  { %v428_v34 = vmul.f32 1.6732632, %v537_v31  ;;  %v743_v35 = vsel %vm668_vm10, %v389_v32, %v390_v33 }
  0xfd   :  { %397 = vrot.lane.b32.xlu1 %v743_v35, %s601_s2  ;;  %393 = vrot.lane.b32.xlu0 %v743_v35, %s600_s0 }
  0xfe   :  { %v429_v36 = vsel %vm424_vm3, %v689_v63, %v428_v34  ;;  %v582_v37 = vpop.eup %581 }
  0xff   :  { %v430_v38 = vmul.f32 1.050701, %v429_v36  ;;  %v539_v40 = vadd.f32 -1.0, %v582_v37 }
 0x101   :  { %v754_v41 = vsel %vm668_vm10, %v430_v38, %v431_v39  ;;  %v469_v42 = vmul.f32 1.6732632, %v539_v40 }
 0x102   :  { %438 = vrot.lane.b32.xlu1 %v754_v41, %s601_s2  ;;  %434 = vrot.lane.b32.xlu0 %v754_v41, %s600_s0 }
 0x103   :  { %v470_v44 = vsel %vm465_vm4, %v464_v14, %v469_v42 }
 0x104   :  { %v471_v45 = vmul.f32 1.050701, %v470_v44 }
 0x106   :  { %v762_v47 = vsel %vm668_vm10, %v471_v45, %v472_v46 }
 0x107   :  { %479 = vrot.lane.b32.xlu1 %v762_v47, %s601_s2  ;;  %475 = vrot.lane.b32.xlu0 %v762_v47, %s600_s0 }
 0x10b   :  { %409 = vrot.lane.b32.xlu1 %v743_v35, %s602_s23  ;;  %246 = vrot.lane.b32.xlu0 %v695_v0, %s602_s23 }
 0x10f   :  { %450 = vrot.lane.b32.xlu1 %v754_v41, %s602_s23  ;;  %288 = vrot.lane.b32.xlu0 %v710_v11, %s602_s23 }
 0x113   :  { %491 = vrot.lane.b32.xlu1 %v762_v47, %s602_s23  ;;  %330 = vrot.lane.b32.xlu0 %v721_v20, %s602_s23 }
 0x117   :  { %372 = vrot.lane.b32.xlu1 %v732_v27, %s602_s23  ;;  %208 = vrot.lane.b32.xlu0 %v678_v52, %s602_s23 }
 0x155   :  { %v193_v43 = vpop.permute.xlu0 %192 }
 0x156   :  { %v195_v50 = vmul.f32 %v193_v43, %v179_v48 }
 0x159   :  { %v197_v49 = vpop.permute.xlu0 %196 }
 0x15a   :  { %v199_v51 = vmul.f32 %v197_v49, %v678_v52 }
 0x15b   :  { %v231_v53 = vpop.permute.xlu1 %230 }
 0x15c   :  { %v785_v54 = vadd.f32 %v199_v51, %v195_v50 }
 0x15e   :  { %v233_v56 = vmul.f32 %v231_v53, %v785_v54  ;;  %v202_v6 = vmul.f32 1.442695, %v785_v54  ;;  %vm201_vm9 = vcmp.gt.f32.partialorder %v785_v54, 0.0 }
 0x15f   :  { %v235_v55 = vpop.permute.xlu1 %234 }
 0x160   :  { %v237_v57 = vmul.f32 %v235_v55, %v695_v0  ;;  %v273_v58 = vpop.permute.xlu0 %272 }
 0x162   :  { %v238_v59 = vadd.f32 %v237_v57, %v233_v56 }
 0x163   :  { %v277_v60 = vpop.permute.xlu1 %276 }
 0x164   :  { %v240_v61 = vmul.f32 1.442695, %v238_v59  ;;  %v275_v62 = vmul.f32 %v273_v58, %v238_v59  ;;  %v279_v63 = vmul.f32 %v277_v60, %v710_v11  ;;  %vm239_vm5 = vcmp.gt.f32.partialorder %v238_v59, 0.0 }
 0x165   :  { %v315_v1 = vpop.permute.xlu0 %314 }
 0x166   :  { %583 = vpow2.f32 %v240_v61  ;;  %v280_v2 = vadd.f32 %v279_v63, %v275_v62 }
 0x167   :  { %v319_v3 = vpop.permute.xlu1 %318 }
 0x168   :  { %v282_v52 = vmul.f32 1.442695, %v280_v2  ;;  %v317_v4 = vmul.f32 %v315_v1, %v280_v2  ;;  %v321_v5 = vmul.f32 %v319_v3, %v721_v20  ;;  %vm281_vm6 = vcmp.gt.f32.partialorder %v280_v2, 0.0 }
 0x16a   :  { %585 = vpow2.f32 %v282_v52  ;;  %v322_v8 = vadd.f32 %v321_v5, %v317_v4 }
 0x16b   :  { %v357_v0 = vpop.permute.xlu0 %356  ;;  %v361_v9 = vpop.permute.xlu1 %360  ;;  %587 = vpow2.f32 %v202_v6 }
 0x16c   :  { %v324_v10 = vmul.f32 1.442695, %v322_v8  ;;  %v359_v12 = vmul.f32 %v357_v0, %v322_v8  ;;  %v363_v13 = vmul.f32 %v361_v9, %v732_v27  ;;  %vm323_vm7 = vcmp.gt.f32.partialorder %v322_v8, 0.0 }
 0x16e   :  { %589 = vpow2.f32 %v324_v10  ;;  %v793_v11 = vadd.f32 %v363_v13, %v359_v12 }
 0x16f   :  { %v398_v15 = vpop.permute.xlu1 %397  ;;  %v394_v16 = vpop.permute.xlu0 %393 }
 0x170   :  { %v366_v14 = vmul.f32 1.442695, %v793_v11  ;;  %v400_v7 = vmul.f32 %v398_v15, %v743_v35  ;;  %v396_v17 = vmul.f32 %v394_v16, %v793_v11  ;;  %vm365_vm8 = vcmp.gt.f32.partialorder %v793_v11, 0.0 }
 0x172   :  { %591 = vpow2.f32 %v366_v14  ;;  %v401_v19 = vadd.f32 %v400_v7, %v396_v17 }
 0x173   :  { %v584_v18 = vpop.eup %583 }
 0x174   :  { %v439_v20 = vpop.permute.xlu1 %438  ;;  %v435_v21 = vpop.permute.xlu0 %434  ;;  %v528_v22 = vadd.f32 -1.0, %v584_v18  ;;  %v403_v23 = vmul.f32 1.442695, %v401_v19  ;;  %vm402_vm10 = vcmp.gt.f32.partialorder %v401_v19, 0.0 }
 0x175   :  { %v441_v24 = vmul.f32 %v439_v20, %v754_v41  ;;  %v437_v25 = vmul.f32 %v435_v21, %v401_v19 }
 0x176   :  { %v243_v26 = vmul.f32 1.6732632, %v528_v22  ;;  %593 = vpow2.f32 %v403_v23 }
 0x177   :  { %v586_v27 = vpop.eup %585  ;;  %v799_v28 = vadd.f32 %v441_v24, %v437_v25 }
 0x178   :  { %v530_v29 = vadd.f32 -1.0, %v586_v27  ;;  %v588_v31 = vpop.eup %587  ;;  %v244_v34 = vsel %vm239_vm5, %v238_v59, %v243_v26 }
 0x179   :  { %v444_v30 = vmul.f32 1.442695, %v799_v28  ;;  %v480_v32 = vpop.permute.xlu1 %479  ;;  %v476_v33 = vpop.permute.xlu0 %475  ;;  %v245_v41 = vmul.f32 1.050701, %v244_v34  ;;  %v526_v43 = vadd.f32 -1.0, %v588_v31  ;;  %vm443_vm11 = vcmp.gt.f32.partialorder %v799_v28, 0.0 }
 0x17a   :  { %v285_v35 = vmul.f32 1.6732632, %v530_v29  ;;  %v482_v37 = vmul.f32 %v480_v32, %v762_v47  ;;  %v478_v38 = vmul.f32 %v476_v33, %v799_v28 }
 0x17b   :  { %v590_v36 = vpop.eup %589  ;;  %595 = vpow2.f32 %v444_v30  ;;  %v205_v58 = vmul.f32 1.6732632, %v526_v43 }
 0x17c   :  { %v532_v39 = vadd.f32 -1.0, %v590_v36  ;;  %v804_v40 = vadd.f32 %v482_v37, %v478_v38  ;;  %v286_v45 = vsel %vm281_vm6, %v280_v2, %v285_v35 }
 0x17d   :  { %v410_v42 = vpop.permute.xlu1 %409  ;;  %v247_v44 = vpop.permute.xlu0 %246  ;;  %v287_v51 = vmul.f32 1.050701, %v286_v45  ;;  %v206_v3 = vsel %vm201_vm9, %v785_v54, %v205_v58 }
 0x17e   :  { %v327_v46 = vmul.f32 1.6732632, %v532_v39  ;;  %v485_v49 = vmul.f32 1.442695, %v804_v40  ;;  %504 = vst.msk [vmem:[#allocation4] sm:$0xff] %vm42_vm1, %v804_v40  ;;  %v249_v50 = vmul.f32 %v247_v44, %v245_v41  ;;  %vm484_vm12 = vcmp.gt.f32.partialorder %v804_v40, 0.0 }
 0x17f   :  { %v592_v48 = vpop.eup %591  ;;  %v207_v9 = vmul.f32 1.050701, %v206_v3 }
 0x180   :  { %v534_v47 = vadd.f32 -1.0, %v592_v48  ;;  %597 = vpow2.f32 %v485_v49  ;;  %251 = vrot.lane.b32.xlu0 %v249_v50, %s602_s23  ;;  %v328_v56 = vsel %vm323_vm7, %v322_v8, %v327_v46 }
 0x181   :  { %v451_v53 = vpop.permute.xlu1 %450  ;;  %v289_v55 = vpop.permute.xlu0 %288  ;;  %v329_v62 = vmul.f32 1.050701, %v328_v56 }
 0x182   :  { %v369_v57 = vmul.f32 1.6732632, %v534_v47  ;;  %v291_v59 = vmul.f32 %v289_v55, %v287_v51 }
 0x183   :  { %v594_v60 = vpop.eup %593 }
 0x184   :  { %v536_v61 = vadd.f32 -1.0, %v594_v60  ;;  %293 = vrot.lane.b32.xlu0 %v291_v59, %s601_s2  ;;  %v370_v2 = vsel %vm365_vm8, %v793_v11, %v369_v57 }
 0x185   :  { %v492_v63 = vpop.permute.xlu1 %491  ;;  %v331_v1 = vpop.permute.xlu0 %330  ;;  %v371_v0 = vmul.f32 1.050701, %v370_v2 }
 0x186   :  { %v406_v52 = vmul.f32 1.6732632, %v536_v61  ;;  %v333_v4 = vmul.f32 %v331_v1, %v329_v62 }
 0x188   :  { %v596_v5 = vpop.eup %595  ;;  %v407_v6 = vsel %vm402_vm10, %v401_v19, %v406_v52  ;;  %335 = vrot.lane.b32.xlu0 %v333_v4, %s600_s0 }
 0x189   :  { %v538_v8 = vadd.f32 -1.0, %v596_v5  ;;  %v408_v10 = vmul.f32 1.050701, %v407_v6  ;;  %v373_v12 = vpop.permute.xlu1 %372  ;;  %v209_v13 = vpop.permute.xlu0 %208 }
 0x18a   :  { %v375_v15 = vmul.f32 %v373_v12, %v371_v0  ;;  %v211_v16 = vmul.f32 %v209_v13, %v207_v9 }
 0x18b   :  { %v447_v14 = vmul.f32 1.6732632, %v538_v8  ;;  %v412_v7 = vmul.f32 %v410_v42, %v408_v10 }
 0x18c   :  { %376 = vst.msk [vmem:[%s852_s3 + $0x8] sm:$0xff] %vm42_vm1, %v375_v15  ;;  %213 = vst.msk [vmem:[%s852_s3] sm:$0xff] %vm42_vm1, %v211_v16  ;;  %vm296_vm1 = vcmask 785920  }
 0x18d   :  { %v448_v54 = vsel %vm443_vm11, %v799_v28, %v447_v14  ;;  %v598_v11 = vpop.eup %597  ;;  %414 = vrot.lane.b32.xlu1 %v412_v7, %s602_s23 }
 0x18e   :  { %v449_v17 = vmul.f32 1.050701, %v448_v54  ;;  %v540_v18 = vadd.f32 -1.0, %v598_v11 }
 0x190   :  { %v453_v19 = vmul.f32 %v451_v53, %v449_v17  ;;  %v488_v20 = vmul.f32 1.6732632, %v540_v18 }
 0x192   :  { %455 = vrot.lane.b32.xlu1 %v453_v19, %s601_s2  ;;  %v489_v21 = vsel %vm484_vm12, %v804_v40, %v488_v20 }
 0x193   :  { %v490_v22 = vmul.f32 1.050701, %v489_v21 }
 0x195   :  { %v494_v23 = vmul.f32 %v492_v63, %v490_v22 }
 0x197   :  { %496 = vrot.lane.b32.xlu1 %v494_v23, %s600_s0 }
 0x1f2   :  { %v252_v24 = vpop.permute.xlu0 %251 }
 0x1f3   :  { %255 = vst.msk [vmem:[%s852_s3] sm:$0xff] %vm254_vm13, %v252_v24 }
 0x1f6   :  { %v294_v25 = vpop.permute.xlu0 %293 }
 0x1f7   :  { %297 = vst.msk [vmem:[%s852_s3] sm:$0xff] %vm296_vm1, %v294_v25 }
 0x1fa   :  { %v336_v26 = vpop.permute.xlu0 %335 }
 0x1fb   :  { %339 = vst.msk [vmem:[%s852_s3] sm:$0xff] %vm338_vm14, %v336_v26 }
 0x1ff   :  { %v415_v27 = vpop.permute.xlu1 %414 }
 0x200   :  { %417 = vst.msk [vmem:[%s852_s3 + $0x8] sm:$0xff] %vm254_vm13, %v415_v27 }
 0x204   :  { %v456_v28 = vpop.permute.xlu1 %455 }
 0x205   :  { %458 = vst.msk [vmem:[%s852_s3 + $0x8] sm:$0xff] %vm296_vm1, %v456_v28 }
 0x209   :  { %v497_v29 = vpop.permute.xlu1 %496 }
 0x20a   :  { %499 = vst.msk [vmem:[%s852_s3 + $0x8] sm:$0xff] %vm338_vm14, %v497_v29 }

</bundles_post_ra>
